<compile_context>
chip_gen: v6e
topology: v6e:2x2x1
jax: 0.10.0
libtpu: 0.0.40
codegen_flags: <defaults>
</compile_context>

<pallas_src>
import jax
import jax.numpy as jnp
from jax.experimental import pallas as pl
from jax.experimental.pallas import tpu as pltpu

LANE = 128
VMEM_LIMIT = 32 * 1024 * 1024        # scoped VMEM limit we request
EMB_TILE_BUDGET = 20 * 1024 * 1024   # budget for the double-buffered emb tiles


def head_kernel(emb_ref, mask_ref, w3t_ref, b3_ref, w4t_ref, b4_ref, out_ref):
    # ---- masked mean pooling (torch.clamp(min=1e-9) on the denominator) ----
    emb = emb_ref[...].astype(jnp.float32)                 # [tb, S, H] (bf16 -> f32)
    mask = mask_ref[...].astype(jnp.float32)               # [tb, S, 1]
    summed = jnp.sum(emb * mask, axis=1)                   # [tb, H]
    denom = jnp.maximum(jnp.sum(mask, axis=1), 1e-9)       # [tb, 1]
    pooled = summed / denom                                 # [tb, H]

    # ---- l3: Linear(H, 68) + sigmoid (weights pre-transposed, lane-padded) ----
    z3 = jnp.dot(pooled, w3t_ref[...],
                 preferred_element_type=jnp.float32) + b3_ref[...]   # [tb, HID_PAD]
    h = jax.nn.sigmoid(z3)

    # ---- l4: Linear(68, C) + softmax over classes ----
    # Padded logit columns carry a -1e30 bias -> exp() == 0, softmax unaffected.
    z4 = jnp.dot(h, w4t_ref[...],
                 preferred_element_type=jnp.float32) + b4_ref[...]   # [tb, C_PAD]
    z4 = z4 - jnp.max(z4, axis=1, keepdims=True)
    e = jnp.exp(z4)
    inv_sum = pl.reciprocal(jnp.sum(e, axis=1, keepdims=True), approx=True)
    out_ref[...] = (e * inv_sum).astype(out_ref.dtype)


def _choose_tb(B, S, H):
    """Largest batch tile (multiple of 8) whose double-buffered bf16 emb tile
    plus f32 mask tile fits the VMEM budget."""
    per_row = 2 * S * H * 2 + 2 * S * 4   # 2 bufs * (bf16 emb row + f32 mask row)
    tb = (EMB_TILE_BUDGET // max(per_row, 1)) // 8 * 8
    tb = max(8, min(tb, 512))
    tb = min(tb, pl.cdiv(B, 8) * 8)       # never bigger than the padded batch
    return int(tb)


def net_head_forward(token_embeddings, attention_mask, w3, b3, w4, b4):
    """token_embeddings: [B,S,H]; attention_mask: [B,S]; w3:[68,H] b3:[68];
    w4:[C,68] b4:[C] (PyTorch nn.Linear layout). Returns softmax probs [B,C]."""
    B, S, H = token_embeddings.shape
    HID = w3.shape[0]
    C = w4.shape[0]
    HID_PAD = pl.cdiv(HID, LANE) * LANE
    C_PAD = pl.cdiv(C, LANE) * LANE

    # ---- batch padding / tiling ----
    tb = _choose_tb(B, S, H)
    B_pad = pl.cdiv(B, tb) * tb
    emb = token_embeddings.astype(jnp.bfloat16)                     # halve HBM traffic
    mask = attention_mask.astype(jnp.float32).reshape(B, S, 1)
    if B_pad != B:
        # Padded rows have an all-zero mask -> pooled = 0, no NaNs (clamped denom).
        emb = jnp.pad(emb, ((0, B_pad - B), (0, 0), (0, 0)))
        mask = jnp.pad(mask, ((0, B_pad - B), (0, 0), (0, 0)))

    # ---- pre-transpose + lane-pad parameters (wrapper-side layout plumbing) ----
    w3t = jnp.zeros((H, HID_PAD), jnp.float32).at[:, :HID].set(w3.T.astype(jnp.float32))
    b3p = jnp.zeros((1, HID_PAD), jnp.float32).at[0, :HID].set(b3.astype(jnp.float32))
    w4t = jnp.zeros((HID_PAD, C_PAD), jnp.float32).at[:HID, :C].set(w4.T.astype(jnp.float32))
    b4p = jnp.full((1, C_PAD), -1e30, jnp.float32).at[0, :C].set(b4.astype(jnp.float32))

    grid = (B_pad // tb,)
    out = pl.pallas_call(
        head_kernel,
        out_shape=jax.ShapeDtypeStruct((B_pad, C_PAD), jnp.float32),
        grid=grid,
        in_specs=[
            pl.BlockSpec((tb, S, H), lambda i: (i, 0, 0)),      # streamed emb tile
            pl.BlockSpec((tb, S, 1), lambda i: (i, 0, 0)),      # streamed mask tile
            pl.BlockSpec((H, HID_PAD), lambda i: (0, 0)),       # VMEM-resident weights
            pl.BlockSpec((1, HID_PAD), lambda i: (0, 0)),
            pl.BlockSpec((HID_PAD, C_PAD), lambda i: (0, 0)),
            pl.BlockSpec((1, C_PAD), lambda i: (0, 0)),
        ],
        out_specs=pl.BlockSpec((tb, C_PAD), lambda i: (i, 0)),  # lane-dense output slab
        compiler_params=pltpu.CompilerParams(
            dimension_semantics=("parallel",),                  # megacore on v7x
            vmem_limit_bytes=VMEM_LIMIT,
        ),
    )(emb, mask, w3t, b3p, w4t, b4p)

    return out[:B, :C]


def reference_forward(token_embeddings, attention_mask, w3, b3, w4, b4):
    # Pure-JAX reference of the head (embeddings rounded through bf16 like the
    # kernel's HBM dtype, so the comparison isolates the kernel math).
    emb = token_embeddings.astype(jnp.bfloat16).astype(jnp.float32)
    m = attention_mask.astype(jnp.float32)[:, :, None]
    pooled = jnp.sum(emb * m, axis=1) / jnp.maximum(jnp.sum(m, axis=1), 1e-9)
    h = jax.nn.sigmoid(pooled @ w3.T + b3)
    return jax.nn.softmax(h @ w4.T + b4, axis=1)


if __name__ == "__main__":
    # Small synthetic shapes consistent with the forward pass:
    # batch=2, seq=8, hidden=32 (stand-in for ALBERT hidden_size), class_num=4.
    B, S, H, HID, C = 2, 8, 32, 68, 4

    key = jax.random.PRNGKey(0)
    k_emb, k_w3, k_b3, k_w4, k_b4 = jax.random.split(key, 5)

    token_embeddings = jax.random.normal(k_emb, (B, S, H), dtype=jnp.float32)
    # attention mask: first batch fully valid, second batch has padding.
    attention_mask = jnp.array(
        [[1] * S, [1] * (S // 2) + [0] * (S - S // 2)], dtype=jnp.float32
    )

    # Deterministic parameter init (PyTorch nn.Linear layout: [out, in]).
    w3 = jax.random.normal(k_w3, (HID, H), dtype=jnp.float32) * 0.1
    b3 = jax.random.normal(k_b3, (HID,), dtype=jnp.float32) * 0.1
    w4 = jax.random.normal(k_w4, (C, HID), dtype=jnp.float32) * 0.1
    b4 = jax.random.normal(k_b4, (C,), dtype=jnp.float32) * 0.1

    out = net_head_forward(token_embeddings, attention_mask, w3, b3, w4, b4)
    out = jax.block_until_ready(out)

    ref = reference_forward(token_embeddings, attention_mask, w3, b3, w4, b4)
    assert out.shape == (B, C), out.shape
    # Tolerance covers bf16 embedding rounding + the approx (EUP) softmax recip.
    assert jnp.allclose(out, ref, atol=2e-3, rtol=2e-3), (out, ref)
    assert jnp.allclose(jnp.sum(out, axis=1), jnp.ones((B,)), atol=2e-3)

    print("KERNEL_OK")
</pallas_src>

<mosaic_0001>
module attributes {stable_mosaic.version = 11 : i64} {
  func.func @head_kernel(%arg0: i32, %arg1: memref<8x8x32xbf16, #tpu.memory_space<vmem>>, %arg2: memref<8x8x1xf32, #tpu.memory_space<vmem>>, %arg3: memref<32x128xf32, #tpu.memory_space<vmem>>, %arg4: memref<1x128xf32, #tpu.memory_space<vmem>>, %arg5: memref<128x128xf32, #tpu.memory_space<vmem>>, %arg6: memref<1x128xf32, #tpu.memory_space<vmem>>, %arg7: memref<8x128xf32, #tpu.memory_space<vmem>>) attributes {dimension_semantics = [#tpu.dimension_semantics<parallel>], iteration_bounds = array<i64: 1>, scalar_prefetch = 0 : i64, scratch_operands = 0 : i64, tpu.core_type = #tpu.core_type<tc>, window_params = [{transform_indices = @transform_0, window_bounds = array<i64: 8, 8, 32>}, {transform_indices = @transform_1, window_bounds = array<i64: 8, 8, 1>}, {pipeline_mode = #tpu.pipeline_mode<synchronous>, transform_indices = @transform_2, window_bounds = array<i64: 32, 128>}, {pipeline_mode = #tpu.pipeline_mode<synchronous>, transform_indices = @transform_3, window_bounds = array<i64: 1, 128>}, {pipeline_mode = #tpu.pipeline_mode<synchronous>, transform_indices = @transform_4, window_bounds = array<i64: 128, 128>}, {pipeline_mode = #tpu.pipeline_mode<synchronous>, transform_indices = @transform_5, window_bounds = array<i64: 1, 128>}, {transform_indices = @transform_6, window_bounds = array<i64: 8, 128>}]} {
    %c0 = arith.constant 0 : index
    %c0_0 = arith.constant 0 : index
    %c0_1 = arith.constant 0 : index
    %0 = vector.load %arg1[%c0, %c0_0, %c0_1] : memref<8x8x32xbf16, #tpu.memory_space<vmem>>, vector<8x8x32xbf16>
    %1 = arith.extf %0 : vector<8x8x32xbf16> to vector<8x8x32xf32>
    %c0_2 = arith.constant 0 : index
    %c0_3 = arith.constant 0 : index
    %c0_4 = arith.constant 0 : index
    %2 = vector.load %arg2[%c0_2, %c0_3, %c0_4] : memref<8x8x1xf32, #tpu.memory_space<vmem>>, vector<8x8x1xf32>
    %3 = vector.broadcast %2 : vector<8x8x1xf32> to vector<8x8x32xf32>
    %4 = arith.mulf %1, %3 : vector<8x8x32xf32>
    %cst = arith.constant dense<0.000000e+00> : vector<8x32xf32>
    %5 = vector.multi_reduction <add>, %4, %cst [1] : vector<8x8x32xf32> to vector<8x32xf32>
    %cst_5 = arith.constant dense<0.000000e+00> : vector<8x1xf32>
    %6 = vector.multi_reduction <add>, %2, %cst_5 [1] : vector<8x8x1xf32> to vector<8x1xf32>
    %cst_6 = arith.constant 9.99999971E-10 : f32
    %7 = vector.broadcast %cst_6 : f32 to vector<8x1xf32>
    %8 = arith.maximumf %6, %7 : vector<8x1xf32>
    %9 = vector.broadcast %8 : vector<8x1xf32> to vector<8x32xf32>
    %10 = arith.divf %5, %9 : vector<8x32xf32>
    %c0_7 = arith.constant 0 : index
    %c0_8 = arith.constant 0 : index
    %11 = vector.load %arg3[%c0_7, %c0_8] : memref<32x128xf32, #tpu.memory_space<vmem>>, vector<32x128xf32>
    %cst_9 = arith.constant dense<0.000000e+00> : vector<8x128xf32>
    %12 = tpu.matmul %10, %11, %cst_9 {dimension_numbers = #tpu.dot_dimension_numbers<[1], [0], [0], [1], [0, 0, 1, 1], [], []>} : vector<8x32xf32>, vector<32x128xf32>, vector<8x128xf32> -> vector<8x128xf32>
    %c0_10 = arith.constant 0 : index
    %c0_11 = arith.constant 0 : index
    %13 = vector.load %arg4[%c0_10, %c0_11] : memref<1x128xf32, #tpu.memory_space<vmem>>, vector<1x128xf32>
    %14 = vector.broadcast %13 : vector<1x128xf32> to vector<8x128xf32>
    %15 = arith.addf %12, %14 : vector<8x128xf32>
    %16 = arith.negf %15 : vector<8x128xf32>
    %17 = math.exp %16 : vector<8x128xf32>
    %cst_12 = arith.constant 1.000000e+00 : f32
    %18 = vector.broadcast %cst_12 : f32 to vector<8x128xf32>
    %19 = arith.addf %18, %17 : vector<8x128xf32>
    %20 = arith.divf %18, %19 : vector<8x128xf32>
    %c0_13 = arith.constant 0 : index
    %c0_14 = arith.constant 0 : index
    %21 = vector.load %arg5[%c0_13, %c0_14] : memref<128x128xf32, #tpu.memory_space<vmem>>, vector<128x128xf32>
    %cst_15 = arith.constant dense<0.000000e+00> : vector<8x128xf32>
    %22 = tpu.matmul %20, %21, %cst_15 {dimension_numbers = #tpu.dot_dimension_numbers<[1], [0], [0], [1], [0, 0, 1, 1], [], []>} : vector<8x128xf32>, vector<128x128xf32>, vector<8x128xf32> -> vector<8x128xf32>
    %c0_16 = arith.constant 0 : index
    %c0_17 = arith.constant 0 : index
    %23 = vector.load %arg6[%c0_16, %c0_17] : memref<1x128xf32, #tpu.memory_space<vmem>>, vector<1x128xf32>
    %24 = vector.broadcast %23 : vector<1x128xf32> to vector<8x128xf32>
    %25 = arith.addf %22, %24 : vector<8x128xf32>
    %cst_18 = arith.constant dense<0xFF800000> : vector<8xf32>
    %26 = vector.multi_reduction <maximumf>, %25, %cst_18 [1] : vector<8x128xf32> to vector<8xf32>
    %27 = vector.shape_cast %26 : vector<8xf32> to vector<8x1xf32>
    %28 = vector.broadcast %27 : vector<8x1xf32> to vector<8x128xf32>
    %29 = arith.subf %25, %28 : vector<8x128xf32>
    %30 = math.exp %29 : vector<8x128xf32>
    %cst_19 = arith.constant dense<0.000000e+00> : vector<8xf32>
    %31 = vector.multi_reduction <add>, %30, %cst_19 [1] : vector<8x128xf32> to vector<8xf32>
    %32 = vector.shape_cast %31 : vector<8xf32> to vector<8x1xf32>
    %33 = tpu.reciprocal %32 {approx = true} : vector<8x1xf32> -> vector<8x1xf32>
    %34 = vector.broadcast %33 : vector<8x1xf32> to vector<8x128xf32>
    %35 = arith.mulf %30, %34 : vector<8x128xf32>
    %c0_20 = arith.constant 0 : index
    %c0_21 = arith.constant 0 : index
    %36 = vector.load %arg7[%c0_20, %c0_21] : memref<8x128xf32, #tpu.memory_space<vmem>>, vector<8x128xf32>
    tpu.vector_store %arg7[%c0_20, %c0_21], %35 {strides = array<i32>} : memref<8x128xf32, #tpu.memory_space<vmem>>, vector<8x128xf32>,
    return
  }
  func.func @transform_0(%arg0: i32) -> (i32, i32, i32) {
    %c0_i32 = arith.constant 0 : i32
    %c0_i32_0 = arith.constant 0 : i32
    %c0_i32_1 = arith.constant 0 : i32
    return %arg0, %c0_i32, %c0_i32_0 : i32, i32, i32
  }
  func.func @transform_1(%arg0: i32) -> (i32, i32, i32) {
    %c0_i32 = arith.constant 0 : i32
    %c0_i32_0 = arith.constant 0 : i32
    %c0_i32_1 = arith.constant 0 : i32
    return %arg0, %c0_i32, %c0_i32_0 : i32, i32, i32
  }
  func.func @transform_2(%arg0: i32) -> (i32, i32) {
    %c0_i32 = arith.constant 0 : i32
    %c0_i32_0 = arith.constant 0 : i32
    %c0_i32_1 = arith.constant 0 : i32
    return %c0_i32, %c0_i32_0 : i32, i32
  }
  func.func @transform_3(%arg0: i32) -> (i32, i32) {
    %c0_i32 = arith.constant 0 : i32
    %c0_i32_0 = arith.constant 0 : i32
    %c0_i32_1 = arith.constant 0 : i32
    return %c0_i32, %c0_i32_0 : i32, i32
  }
  func.func @transform_4(%arg0: i32) -> (i32, i32) {
    %c0_i32 = arith.constant 0 : i32
    %c0_i32_0 = arith.constant 0 : i32
    %c0_i32_1 = arith.constant 0 : i32
    return %c0_i32, %c0_i32_0 : i32, i32
  }
  func.func @transform_5(%arg0: i32) -> (i32, i32) {
    %c0_i32 = arith.constant 0 : i32
    %c0_i32_0 = arith.constant 0 : i32
    %c0_i32_1 = arith.constant 0 : i32
    return %c0_i32, %c0_i32_0 : i32, i32
  }
  func.func @transform_6(%arg0: i32) -> (i32, i32) {
    %c0_i32 = arith.constant 0 : i32
    %c0_i32_0 = arith.constant 0 : i32
    return %arg0, %c0_i32 : i32, i32
  }
}

</mosaic_0001>

<bundles_post_ra>
// kernel: tpu_custom_call.1
= control target key start
LH: loop header
LB: loop body
LE: loop exit
PB: predicated region body
PF: predicated region fallthrough
CT: control target
= control target key end

     0   :  { %11 = vsyncpa [#allocation3], 0  ;;  %s826_s0 = inlined_call_operand.vmem [shape: bf16[8,8,32], index: 0, kind: input, shape index: {}]   ;;  %s827_s1 = inlined_call_operand.vmem [shape: f32[8,8,1], index: 1, kind: input, shape index: {}]   ;;  %s828_s2 = inlined_call_operand.vmem [shape: f32[32,128], index: 2, kind: input, shape index: {}]   ;;  %s829_s3 = inlined_call_operand.vmem [shape: f32[1,128], index: 3, kind: input, shape index: {}]   ;;  %s830_s4 = inlined_call_operand.hbm [shape: f32[128,128], index: 4, kind: input, shape index: {}]   ;;  %s831_s5 = inlined_call_operand.vmem [shape: f32[1,128], index: 5, kind: input, shape index: {}]   ;;  %s832_s6 = inlined_call_operand.hbm [shape: f32[8,128], index: 6, kind: output, shape index: {}]  }
   0x1   :  { %12 = vsyncpa [#allocation4], 0  ;;  %s685_s21 = smov [#allocation2]  }
   0x2   :  { %s26_s22 = sshll.u32 %s685_s21, 4  ;;  %s27_s22 = int_to_ptr.vmem [resolvable:$true] %s26_s22 }
   0x3   :  { %s649_s23 = scalar_lea.vmem %s27_s22, 2048  ;;  %p654_p1 = scmp.lt.s32.totalorder %s27_s22, %s27_s22 }
   0x4   :  { %p650_p0 = scmp.ne.s32.totalorder %s27_s22, %s649_s23  ;;  %p655_p2 = scmp.lt.s32.totalorder %s649_s23, %s649_s23 }
   0x6   :  { %p656_p3 = por %p655_p2, %p654_p1 }
   0x8   :  { %p657_p4 = pnand %p656_p3, %p650_p0 }
   0xa   :  { %660 = shalt.err (!%p657_p4)
}
   0xb   :  { %s686_s24 = smov 128   ;;  %s687_s25 = smov 8  }
   0xc   :  { %32 = dma.hbm_to_vmem [thread:$0]  %s830_s4, 2048, %s27_s22, [#allocation3], %s686_s24, %s686_s24, %s687_s25  }
   0xd   :  { %681 = dma.done.wait [#allocation3], 2048  }
   0xe   :  { %682 = vsyncadd [#allocation3], 4294965248  ;;  %v688_v0 = vmov 0   ;;  %vm167_vm0 = vcmask 7168   ;;  %v56_v1 = vld [vmem:[%s827_s1 + $0x10] sm:$0xff]  ;;  %v54_v2 = vld [vmem:[%s827_s1] sm:$0xff] }
   0xf   :  { %616 = vset.pattern.permute.xlu1 %v688_v0  ;;  %615 = vset.pattern.permute.xlu0 %v688_v0  ;;  %v57_v3 = vld [vmem:[%s827_s1 + $0x18] sm:$0xff]  ;;  %v182_v4 = vsel %vm167_vm0, %v56_v1, 0.0  ;;  %v168_v5 = vsel %vm167_vm0, %v54_v2, 0.0  ;;  %v55_v7 = vld [vmem:[%s827_s1 + $0x8] sm:$0xff]  ;;  %v58_v8 = vld [vmem:[%s827_s1 + $0x20] sm:$0xff]  ;;  %vm690_vm1 = vmmov 0  }
  0x10   :  { %74 = vperm.xlu1 %616, %v56_v1   ;;  %64 = vperm.xlu0 %615, %v54_v2   ;;  %v189_v6 = vsel %vm167_vm0, %v57_v3, 0.0  ;;  %v59_v9 = vld [vmem:[%s827_s1 + $0x28] sm:$0xff]  ;;  %v183_v10 = vrot.slane %v182_v4, 4  ;;  %v169_v11 = vrot.slane %v168_v5, 4  ;;  %v175_v13 = vsel %vm167_vm0, %v55_v7, 0.0  ;;  %v60_v14 = vld [vmem:[%s827_s1 + $0x30] sm:$0xff] }
  0x11   :  { %v190_v12 = vrot.slane %v189_v6, 4  ;;  %v61_v15 = vld [vmem:[%s827_s1 + $0x38] sm:$0xff]  ;;  %v176_v16 = vrot.slane %v175_v13, 4  ;;  %v196_v17 = vsel %vm167_vm0, %v58_v8, 0.0  ;;  %v203_v18 = vsel %vm167_vm0, %v59_v9, 0.0 }
  0x12   :  { %v210_v19 = vsel %vm167_vm0, %v60_v14, 0.0  ;;  %v184_v20 = vadd.f32 %v183_v10, %v182_v4  ;;  %v170_v21 = vadd.f32 %v169_v11, %v168_v5  ;;  %v197_v23 = vrot.slane %v196_v17, 4  ;;  %v290_v11 = vld [vmem:[%s828_s2 + $0x10] sm:$0xff] }
  0x13   :  { %v191_v22 = vadd.f32 %v190_v12, %v189_v6  ;;  %v177_v24 = vadd.f32 %v176_v16, %v175_v13  ;;  %v204_v25 = vrot.slane %v203_v18, 4  ;;  %v217_v26 = vsel %vm167_vm0, %v61_v15, 0.0  ;;  %v289_v12 = vld [vmem:[%s828_s2 + $0x8] sm:$0xff]  ;;  %v288_v13 = vld [vmem:[%s828_s2] sm:$0xff] }
  0x14   :  { %79 = vperm.xlu1 %616, %v57_v3   ;;  %69 = vperm.xlu0 %615, %v55_v7   ;;  %v185_v27 = vrot.slane %v184_v20, 2  ;;  %v171_v28 = vrot.slane %v170_v21, 2  ;;  %v198_v30 = vadd.f32 %v197_v23, %v196_v17  ;;  %v211_v33 = vrot.slane %v210_v19, 4  ;;  %v522_v16 = vld [vmem:[%s826_s0] sm:$0xff]  }
  0x15   :  { %v192_v29 = vrot.slane %v191_v22, 2  ;;  %v178_v31 = vrot.slane %v177_v24, 2  ;;  %v205_v32 = vadd.f32 %v204_v25, %v203_v18  ;;  %v218_v34 = vrot.slane %v217_v26, 4 }
  0x16   :  { %v186_v35 = vadd.f32 %v185_v27, %v184_v20  ;;  %v172_v36 = vadd.f32 %v171_v28, %v170_v21  ;;  %v199_v38 = vrot.slane %v198_v30, 2  ;;  %v212_v47 = vadd.f32 %v211_v33, %v210_v19  ;;  %v537_v20 = vld [vmem:[%s826_s0 + $0x8] sm:$0xff]  }
  0x17   :  { %v193_v37 = vadd.f32 %v192_v29, %v191_v22  ;;  %v179_v39 = vadd.f32 %v178_v31, %v177_v24  ;;  %v219_v40 = vadd.f32 %v218_v34, %v217_v26  ;;  %v206_v46 = vrot.slane %v205_v32, 2  ;;  %v538_v24 = vld [vmem:[%s826_s0 + $0x10] sm:$0xff]  }
  0x18   :  { %84 = vperm.xlu1 %616, %v58_v8   ;;  %v187_v41 = vrot.slane %v186_v35, 1  ;;  %v173_v42 = vrot.slane %v172_v36, 1  ;;  %v200_v45 = vadd.f32 %v199_v38, %v198_v30  ;;  %v213_v55 = vrot.slane %v212_v47, 2 }
  0x19   :  { %v180_v43 = vrot.slane %v179_v39, 1  ;;  %v220_v44 = vrot.slane %v219_v40, 2  ;;  %v194_v48 = vrot.slane %v193_v37, 1  ;;  %v207_v54 = vadd.f32 %v206_v46, %v205_v32  ;;  %v539_v32 = vld [vmem:[%s826_s0 + $0x18] sm:$0xff]  }
  0x1a   :  { %v188_v50 = vadd.f32 %v187_v41, %v186_v35  ;;  %v174_v51 = vadd.f32 %v173_v42, %v172_v36  ;;  %v201_v59 = vrot.slane %v200_v45, 1  ;;  %v214_v61 = vadd.f32 %v213_v55, %v212_v47 }
  0x1b   :  { %v181_v49 = vadd.f32 %v180_v43, %v179_v39  ;;  %v221_v52 = vadd.f32 %v220_v44, %v219_v40  ;;  %v195_v56 = vadd.f32 %v194_v48, %v193_v37  ;;  %v208_v1 = vrot.slane %v207_v54, 1 }
  0x1c   :  { %89 = vperm.xlu1 %616, %v59_v9   ;;  %v226_v57 = vmax.f32 %v188_v50, 1e-09  ;;  %v224_v58 = vmax.f32 %v174_v51, 1e-09  ;;  %v202_v63 = vadd.f32 %v201_v59, %v200_v45  ;;  %v215_v5 = vrot.slane %v214_v61, 1  ;;  %v291_v9 = vld [vmem:[%s828_s2 + $0x18] sm:$0xff] }
  0x1d   :  { %v225_v53 = vmax.f32 %v181_v49, 1e-09  ;;  %v222_v60 = vrot.slane %v221_v52, 1  ;;  %v227_v62 = vmax.f32 %v195_v56, 1e-09  ;;  %v209_v4 = vadd.f32 %v208_v1, %v207_v54 }
  0x1e   :  { %v228_v2 = vmax.f32 %v202_v63, 1e-09  ;;  %v216_v7 = vadd.f32 %v215_v5, %v214_v61  ;;  %v689_v10 = vmov 0.0   ;;  %v523_v18 = vunpack.c.l.bf16 %v522_v16 }
  0x1f   :  { %239 = vperm.xlu0 %615, %v225_v53   ;;  %v223_v0 = vadd.f32 %v222_v60, %v221_v52  ;;  %v229_v6 = vmax.f32 %v209_v4, 1e-09  ;;  %562 = vmatprep.subr.mxu0 %v689_v10  ;;  %v524_v21 = vunpack.c.h.bf16 %v522_v16  ;;  %vm110_vm2 = vcmask 261120  }
  0x20   :  { %94 = vperm.xlu1 %616, %v60_v14   ;;  %v230_v8 = vmax.f32 %v216_v7, 1e-09  ;;  %570 = vmatprep.mubr.msk.f32.mxu0 %vm690_vm1, %v689_v10  ;;  %v527_v25 = vunpack.c.l.bf16 %v537_v20  ;;  %v528_v27 = vunpack.c.h.bf16 %v537_v20  ;;  %v531_v29 = vunpack.c.l.bf16 %v538_v24 }
  0x21   :  { %v231_v3 = vmax.f32 %v223_v0, 1e-09  ;;  %563 = vmatpush3.msra.mxu0 %v291_v9  ;;  %573 = vmatprep.subr.mxu1 %v689_v10  ;;  %v532_v31 = vunpack.c.h.bf16 %v538_v24  ;;  %v535_v40 = vunpack.c.l.bf16 %v539_v32  ;;  %v536_v47 = vunpack.c.h.bf16 %v539_v32 }
  0x22   :  { %564 = vmatprep.subr.mxu0 %v689_v10  ;;  %605 = vmatprep.mubr.msk.f32.mxu1 %vm690_vm1, %v689_v10  ;;  %vm307_vm3 = vcmask 1041409   ;;  %vm309_vm4 = vcmask 1042434   ;;  %vm311_vm5 = vcmask 1043459   ;;  %vm313_vm6 = vcmask 1044484  }
  0x23   :  { %244 = vperm.xlu0 %615, %v226_v57   ;;  %565 = vmatpush3.msra.mxu0 %v290_v11  ;;  %vm315_vm7 = vcmask 1045509   ;;  %vm317_vm8 = vcmask 1046534   ;;  %vm319_vm9 = vcmask 1047559  }
  0x24   :  { %234 = vperm.xlu1 %616, %v224_v58   ;;  %566 = vmatprep.subr.mxu0 %v689_v10 }
  0x25   :  { %567 = vmatpush3.msra.mxu0 %v289_v12 }
  0x26   :  { %568 = vmatprep.subr.mxu0 %v689_v10 }
  0x27   :  { %249 = vperm.xlu0 %615, %v227_v62   ;;  %569 = vmatpush3.msra.mxu0 %v288_v13 }
  0x28   :  { %99 = vperm.xlu1 %616, %v61_v15  }
  0x2b   :  { %254 = vperm.xlu0 %615, %v228_v2  }
  0x2c   :  { %269 = vperm.xlu1 %616, %v231_v3  }
  0x2f   :  { %259 = vperm.xlu0 %615, %v229_v6  }
  0x33   :  { %264 = vperm.xlu0 %615, %v230_v8  }
  0x8b   :  { %v75_v14 = vpop.permute.xlu1 %74  ;;  %v65_v15 = vpop.permute.xlu0 %64 }
  0x8c   :  { %v102_v23 = vmul.f32 %v523_v18, %v65_v15  ;;  %v104_v33 = vmul.f32 %v527_v25, %v75_v14 }
  0x8e   :  { %v111_v30 = vsel %vm110_vm2, %v102_v23, 0.0  ;;  %v125_v42 = vsel %vm110_vm2, %v104_v33, 0.0 }
  0x8f   :  { %v80_v17 = vpop.permute.xlu1 %79  ;;  %v70_v22 = vpop.permute.xlu0 %69  ;;  %v112_v38 = vrot.slane %v111_v30, 4  ;;  %v126_v51 = vrot.slane %v125_v42, 4 }
  0x90   :  { %v103_v28 = vmul.f32 %v524_v21, %v70_v22  ;;  %v105_v36 = vmul.f32 %v528_v27, %v80_v17 }
  0x91   :  { %v113_v48 = vadd.f32 %v112_v38, %v111_v30  ;;  %v127_v62 = vadd.f32 %v126_v51, %v125_v42 }
  0x92   :  { %v118_v37 = vsel %vm110_vm2, %v103_v28, 0.0  ;;  %v132_v46 = vsel %vm110_vm2, %v105_v36, 0.0 }
  0x93   :  { %v85_v19 = vpop.permute.xlu1 %84  ;;  %v119_v43 = vrot.slane %v118_v37, 4  ;;  %v133_v53 = vrot.slane %v132_v46, 4  ;;  %v114_v59 = vrot.slane %v113_v48, 2  ;;  %v128_v8 = vrot.slane %v127_v62, 2 }
  0x94   :  { %v106_v39 = vmul.f32 %v531_v29, %v85_v19 }
  0x95   :  { %v120_v54 = vadd.f32 %v119_v43, %v118_v37  ;;  %v134_v0 = vadd.f32 %v133_v53, %v132_v46  ;;  %v115_v5 = vadd.f32 %v114_v59, %v113_v48  ;;  %v129_v19 = vadd.f32 %v128_v8, %v127_v62  ;;  %v408_v8 = vld [vmem:[#allocation2 + $0x48] sm:$0xff] }
  0x96   :  { %v139_v49 = vsel %vm110_vm2, %v106_v39, 0.0 }
  0x97   :  { %v90_v26 = vpop.permute.xlu1 %89  ;;  %v140_v57 = vrot.slane %v139_v49, 4  ;;  %v121_v1 = vrot.slane %v120_v54, 2  ;;  %v135_v9 = vrot.slane %v134_v0, 2  ;;  %v116_v16 = vrot.slane %v115_v5, 1 }
  0x98   :  { %v107_v41 = vmul.f32 %v532_v31, %v90_v26  ;;  %v130_v30 = vrot.slane %v129_v19, 1 }
  0x99   :  { %v141_v3 = vadd.f32 %v140_v57, %v139_v49  ;;  %v122_v11 = vadd.f32 %v121_v1, %v120_v54  ;;  %v136_v20 = vadd.f32 %v135_v9, %v134_v0  ;;  %v117_v26 = vadd.f32 %v116_v16, %v115_v5  ;;  %v411_v5 = vld [vmem:[#allocation2 + $0x60] sm:$0xff]  ;;  %v401_v16 = vld [vmem:[#allocation2 + $0x10] sm:$0xff] }
  0x9a   :  { %v240_v34 = vpop.permute.xlu0 %239  ;;  %v146_v52 = vsel %vm110_vm2, %v107_v41, 0.0  ;;  %v131_v41 = vadd.f32 %v130_v30, %v129_v19  ;;  %v407_v9 = vld [vmem:[#allocation2 + $0x40] sm:$0xff] }
  0x9b   :  { %v95_v35 = vpop.permute.xlu1 %94  ;;  %v147_v60 = vrot.slane %v146_v52, 4  ;;  %v142_v13 = vrot.slane %v141_v3, 2  ;;  %v123_v21 = vrot.slane %v122_v11, 1  ;;  %v137_v31 = vrot.slane %v136_v20, 1  ;;  %v517_v19 = vld [vmem:[%s829_s3] ss:$0 sm:$0xff] }
  0x9c   :  { %v108_v50 = vmul.f32 %v535_v40, %v95_v35  ;;  %s691_s3 = smov [#allocation5]  }
  0x9d   :  { %v148_v6 = vadd.f32 %v147_v60, %v146_v52  ;;  %v143_v24 = vadd.f32 %v142_v13, %v141_v3  ;;  %v124_v32 = vadd.f32 %v123_v21, %v122_v11  ;;  %v138_v43 = vadd.f32 %v137_v31, %v136_v20  ;;  %v413_v3 = vld [vmem:[#allocation2 + $0x70] sm:$0xff]  ;;  %v406_v11 = vld [vmem:[#allocation2 + $0x38] sm:$0xff]  ;;  %v404_v13 = vld [vmem:[#allocation2 + $0x28] sm:$0xff]  ;;  %s508_s11 = sshll.u32 %s691_s3, 4  ;;  %s509_s11 = int_to_ptr.vmem [resolvable:$true] %s508_s11 }
  0x9e   :  { %v245_v44 = vpop.permute.xlu0 %244  ;;  %v153_v61 = vsel %vm110_vm2, %v108_v50, 0.0  ;;  %s661_s12 = scalar_lea.vmem %s509_s11, 128  ;;  %p666_p6 = scmp.lt.s32.totalorder %s509_s11, %s509_s11 }
  0x9f   :  { %v235_v45 = vpop.permute.xlu1 %234  ;;  %v154_v4 = vrot.slane %v153_v61, 4  ;;  %v149_v17 = vrot.slane %v148_v6, 2  ;;  %p662_p5 = scmp.ne.s32.totalorder %s509_s11, %s661_s12  ;;  %p667_p7 = scmp.lt.s32.totalorder %s661_s12, %s661_s12 }
  0xa0   :  { %617 = vrcp.f32 %v235_v45 }
  0xa1   :  { %619 = vrcp.f32 %v240_v34  ;;  %v155_v14 = vadd.f32 %v154_v4, %v153_v61  ;;  %v150_v27 = vadd.f32 %v149_v17, %v148_v6  ;;  %v144_v34 = vrot.slane %v143_v24, 1  ;;  %v412_v4 = vld [vmem:[#allocation2 + $0x68] sm:$0xff]  ;;  %v410_v6 = vld [vmem:[#allocation2 + $0x58] sm:$0xff]  ;;  %p668_p8 = por %p667_p7, %p666_p6 }
  0xa2   :  { %v250_v55 = vpop.permute.xlu0 %249  ;;  %621 = vrcp.f32 %v245_v44  ;;  %v400_v17 = vld [vmem:[#allocation2 + $0x8] sm:$0xff] }
  0xa3   :  { %v100_v56 = vpop.permute.xlu1 %99  ;;  %623 = vrcp.f32 %v250_v55  ;;  %v156_v25 = vrot.slane %v155_v14, 2  ;;  %v151_v37 = vrot.slane %v150_v27, 1  ;;  %v145_v45 = vadd.f32 %v144_v34, %v143_v24  ;;  %p669_p9 = pnand %p668_p8, %p662_p5 }
  0xa4   :  { %v109_v58 = vmul.f32 %v536_v47, %v100_v56 }
  0xa5   :  { %v157_v35 = vadd.f32 %v156_v25, %v155_v14  ;;  %v152_v49 = vadd.f32 %v151_v37, %v150_v27  ;;  %v403_v14 = vld [vmem:[#allocation2 + $0x20] sm:$0xff] }
  0xa6   :  { %v160_v63 = vsel %vm110_vm2, %v109_v58, 0.0  ;;  %v255_v2 = vpop.permute.xlu0 %254  ;;  %v520_v27 = vld [vmem:[%s831_s5] ss:$0 sm:$0xff] }
  0xa7   :  { %v161_v7 = vrot.slane %v160_v63, 4  ;;  %625 = vrcp.f32 %v255_v2  ;;  %v270_v15 = vpop.permute.xlu1 %269  ;;  %v158_v46 = vrot.slane %v157_v35, 1  ;;  %v414_v2 = vld [vmem:[#allocation2 + $0x78] sm:$0xff] }
  0xa8   :  { %574 = vmatpush3.msra.mxu1 %v414_v2 }
  0xa9   :  { %v162_v18 = vadd.f32 %v161_v7, %v160_v63  ;;  %v159_v56 = vadd.f32 %v158_v46, %v157_v35  ;;  %575 = vmatprep.subr.mxu1 %v689_v10  ;;  %v409_v7 = vld [vmem:[#allocation2 + $0x50] sm:$0xff] }
  0xaa   :  { %v260_v12 = vpop.permute.xlu0 %259  ;;  %576 = vmatpush3.msra.mxu1 %v413_v3 }
  0xab   :  { %627 = vrcp.f32 %v260_v12  ;;  %v163_v28 = vrot.slane %v162_v18, 2  ;;  %577 = vmatprep.subr.mxu1 %v689_v10  ;;  %v405_v12 = vld [vmem:[#allocation2 + $0x30] sm:$0xff] }
  0xac   :  { %629 = vrcp.f32 %v270_v15  ;;  %578 = vmatpush3.msra.mxu1 %v412_v4  ;;  %v402_v15 = vld [vmem:[#allocation2 + $0x18] sm:$0xff] }
  0xad   :  { %v618_v23 = vpop.eup %617  ;;  %v164_v39 = vadd.f32 %v163_v28, %v162_v18  ;;  %579 = vmatprep.subr.mxu1 %v689_v10  ;;  %v399_v18 = vld [vmem:[#allocation2] sm:$0xff] }
  0xae   :  { %v265_v22 = vpop.permute.xlu0 %264  ;;  %v620_v29 = vpop.eup %619  ;;  %v273_v33 = vmul.f32 %v618_v23, %v117_v26  ;;  %580 = vmatpush3.msra.mxu1 %v411_v5 }
  0xaf   :  { %631 = vrcp.f32 %v265_v22  ;;  %v622_v36 = vpop.eup %621  ;;  %v275_v38 = vmul.f32 %v620_v29, %v124_v32  ;;  %v165_v51 = vrot.slane %v164_v39, 1  ;;  %581 = vmatprep.subr.mxu1 %v689_v10 }
  0xb0   :  { %v624_v40 = vpop.eup %623  ;;  %v277_v47 = vmul.f32 %v622_v36, %v131_v41  ;;  %582 = vmatpush3.msra.mxu1 %v410_v6 }
  0xb1   :  { %v308_v44 = vsel %vm307_vm3, %v275_v38, %v273_v33  ;;  %v279_v50 = vmul.f32 %v624_v40, %v138_v43  ;;  %v166_v58 = vadd.f32 %v165_v51, %v164_v39  ;;  %583 = vmatprep.subr.mxu1 %v689_v10 }
  0xb2   :  { %v310_v53 = vsel %vm309_vm4, %v277_v47, %v308_v44  ;;  %584 = vmatpush3.msra.mxu1 %v409_v7 }
  0xb3   :  { %v312_v59 = vsel %vm311_vm5, %v279_v50, %v310_v53  ;;  %585 = vmatprep.subr.mxu1 %v689_v10 }
  0xb4   :  { %v626_v42 = vpop.eup %625  ;;  %586 = vmatpush3.msra.mxu1 %v408_v8 }
  0xb5   :  { %v281_v52 = vmul.f32 %v626_v42, %v145_v45  ;;  %587 = vmatprep.subr.mxu1 %v689_v10 }
  0xb6   :  { %588 = vmatpush3.msra.mxu1 %v407_v9 }
  0xb7   :  { %v314_v61 = vsel %vm313_vm6, %v281_v52, %v312_v59  ;;  %589 = vmatprep.subr.mxu1 %v689_v10 }
  0xb8   :  { %v628_v48 = vpop.eup %627  ;;  %590 = vmatpush3.msra.mxu1 %v406_v11 }
  0xb9   :  { %v283_v54 = vmul.f32 %v628_v48, %v152_v49  ;;  %v630_v55 = vpop.eup %629  ;;  %591 = vmatprep.subr.mxu1 %v689_v10 }
  0xba   :  { %v287_v62 = vmul.f32 %v630_v55, %v166_v58  ;;  %592 = vmatpush3.msra.mxu1 %v405_v12 }
  0xbb   :  { %v316_v63 = vsel %vm315_vm7, %v283_v54, %v314_v61  ;;  %593 = vmatprep.subr.mxu1 %v689_v10 }
  0xbc   :  { %v632_v57 = vpop.eup %631  ;;  %594 = vmatpush3.msra.mxu1 %v404_v13 }
  0xbd   :  { %v285_v60 = vmul.f32 %v632_v57, %v159_v56  ;;  %595 = vmatprep.subr.mxu1 %v689_v10 }
  0xbe   :  { %596 = vmatpush3.msra.mxu1 %v403_v14 }
  0xbf   :  { %v318_v0 = vsel %vm317_vm8, %v285_v60, %v316_v63  ;;  %597 = vmatprep.subr.mxu1 %v689_v10 }
  0xc0   :  { %v320_v1 = vsel %vm319_vm9, %v287_v62, %v318_v0  ;;  %598 = vmatpush3.msra.mxu1 %v402_v15 }
  0xc1   :  { %571 = vmatmul.mubr.msk.f32.vlgmr.msra.gmra.mxu0 %vm110_vm2, %v320_v1  ;;  %599 = vmatprep.subr.mxu1 %v689_v10 }
  0xc2   :  { %600 = vmatpush3.msra.mxu1 %v401_v16 }
  0xc3   :  { %601 = vmatprep.subr.mxu1 %v689_v10 }
  0xc4   :  { %602 = vmatpush3.msra.mxu1 %v400_v17 }
  0xc5   :  { %603 = vmatprep.subr.mxu1 %v689_v10 }
  0xc6   :  { %604 = vmatpush3.msra.mxu1 %v399_v18 }
 0x181   :  { %v389_v20 = vpop.f32.mrf.mxu0 }
 0x182   :  { %v390_v21 = vadd.f32 %v517_v19, %v389_v20 }
 0x183   :  { %v572_v22 = vpop.f32.mrf.mxu0 }
 0x184   :  { %v519_v23 = vmul.f32 -1.442695, %v390_v21 }
 0x186   :  { %633 = vpow2.f32 %v519_v23 }
 0x193   :  { %v634_v24 = vpop.eup %633 }
 0x194   :  { %v396_v25 = vadd.f32 1.0, %v634_v24 }
 0x196   :  { %635 = vrcp.f32 %v396_v25 }
 0x1a3   :  { %v636_v26 = vpop.eup %635 }
 0x1a4   :  { %606 = vmatmul.mubr.f32.vlgmr.msra.gmra.mxu1 %v636_v26 }
 0x264   :  { %v488_v10 = vpop.f32.mrf.mxu1 }
 0x265   :  { %v489_v28 = vadd.f32 %v520_v27, %v488_v10 }
 0x266   :  { %v607_v29 = vpop.f32.mrf.mxu1 }
 0x267   :  { %492 = vmax.xlane.f32.xlu0 %v489_v28 }
 0x2f0   :  { %v493_v30 = vpop.xlane.xlu0 %492 }
 0x2f1   :  { %v494_v31 = vsub.f32 %v489_v28, %v493_v30 }
 0x2f3   :  { %v495_v32 = vmul.f32 1.442695, %v494_v31 }
 0x2f5   :  { %637 = vpow2.f32 %v495_v32 }
 0x302   :  { %v638_v33 = vpop.eup %637 }
 0x303   :  { %497 = vadd.xlane.f32.xlu1 %v638_v33 }
 0x38c   :  { %v498_v34 = vpop.xlane.xlu1 %497 }
 0x38d   :  { %639 = vrcp.f32 %v498_v34 }
 0x39a   :  { %v640_v35 = vpop.eup %639 }
 0x39b   :  { %v500_v36 = vmul.f32 %v640_v35, %v638_v33 }
 0x39d   :  { %501 = vst [vmem:[#allocation5] sm:$0xff] %v500_v36 }
 0x39e   :  { %672 = shalt.err (!%p669_p9)
}
 0x39f   :  { %511 = dma.vmem_to_hbm [thread:$0]  %s509_s11, 128, %s832_s6, [#allocation4]  }
 0x3a0   :  { %683 = dma.done.wait [#allocation4], 128  }
 0x3a1   :  { %684 = vsyncadd [#allocation4], 4294967168 }
 0x3a2   :  { %515 = vsyncpa [#allocation3], 1 }
 0x3a3   :  { %516 = vsyncpa [#allocation4], 1 }

</bundles_post_ra>
